<compile_context>
chip_gen: v7x
topology: tpu7x:2x2x1
jax: 0.10.0
libtpu: 0.0.40
codegen_flags: <defaults>
</compile_context>

<pallas_src>
import functools

import jax
import jax.numpy as jnp
from jax.experimental import pallas as pl
from jax.experimental.pallas import tpu as pltpu

_SUBLANE = 8
# ~2 MiB per f32 block; input+output double-buffered = ~8 MiB resident, which fits even
# v5e's 16 MiB default scoped-VMEM limit (and v7x's 32 MiB) without raising vmem limits.
_MAX_BLOCK_ELEMS = 512 * 1024

# lowbias32-style mixing constants (all fit in uint32).
_MIX0 = 0x9E3779B9
_MIX1 = 0x7FEB352D
_MIX2 = 0x846CA68B


def _dropout_kernel(seed_ref, x_ref, o_ref, *, threshold, scale):
    rows, lanes = x_ref.shape

    # Global (flattened, padded) element index of every element in this block.
    row_base = pl.program_id(0) * rows
    row_ids = jax.lax.broadcasted_iota(jnp.int32, (rows, lanes), 0) + row_base
    col_ids = jax.lax.broadcasted_iota(jnp.int32, (rows, lanes), 1)
    idx = (row_ids * lanes + col_ids).astype(jnp.uint32)

    # Counter-based hash: mix per-call seed (times a large odd constant so adjacent
    # seeds land in far-apart streams) with the element index, then avalanche.
    seed_u = seed_ref[0].astype(jnp.uint32) * jnp.uint32(_MIX0)
    h = idx + seed_u
    h = (h ^ (h >> 16)) * jnp.uint32(_MIX1)
    h = (h ^ (h >> 15)) * jnp.uint32(_MIX2)
    h = h ^ (h >> 16)

    rnd = (h >> 1).astype(jnp.int32)        # uniform in [0, 2**31)
    keep = rnd >= jnp.int32(threshold)      # P(keep) = 1 - p

    x = x_ref[...]                          # native dtype (no f32 upcast)
    o_ref[...] = jnp.where(keep, x * jnp.asarray(scale, x.dtype), jnp.zeros_like(x))


def _choose_width(n):
    """Widest lane-dense last dim (multiple of 128) that needs no padding, else 128."""
    for w in (1024, 512, 256, 128):
        if n % (_SUBLANE * w) == 0:
            return w
    return 128


def pallas_dropout(x, p, seed, training=True):
    """Elementwise inverted dropout (torch.nn.functional.dropout semantics)."""
    p = float(p)
    if (not training) or p <= 0.0:
        return x
    if p >= 1.0:
        return jnp.zeros_like(x)

    orig_shape = x.shape
    orig_dtype = x.dtype
    n = x.size

    width = _choose_width(n)
    rows_needed = pl.cdiv(n, width)
    max_rows = _MAX_BLOCK_ELEMS // width
    if rows_needed <= max_rows:
        block_rows = pl.cdiv(rows_needed, _SUBLANE) * _SUBLANE
    else:
        block_rows = max_rows                          # multiple of 8 by construction
    rows_padded = pl.cdiv(rows_needed, block_rows) * block_rows
    n_padded = rows_padded * width

    flat = x.reshape(-1)
    if n_padded != n:                                  # pad only when actually needed
        flat = jnp.pad(flat, (0, n_padded - n))
    x2d = flat.reshape(rows_padded, width)
    grid = rows_padded // block_rows

    threshold = min(int(round(p * (1 << 31))), (1 << 31) - 1)
    scale = 1.0 / (1.0 - p)
    kernel = functools.partial(_dropout_kernel, threshold=threshold, scale=scale)

    seed_arr = jnp.asarray([seed], dtype=jnp.int32)

    out2d = pl.pallas_call(
        kernel,
        out_shape=jax.ShapeDtypeStruct((rows_padded, width), orig_dtype),
        grid_spec=pltpu.PrefetchScalarGridSpec(
            num_scalar_prefetch=1,
            grid=(grid,),
            in_specs=[pl.BlockSpec((block_rows, width), lambda i, seed: (i, 0))],
            out_specs=pl.BlockSpec((block_rows, width), lambda i, seed: (i, 0)),
        ),
        compiler_params=pltpu.CompilerParams(dimension_semantics=("parallel",)),
    )(seed_arr, x2d)

    out_flat = out2d.reshape(-1)
    if n_padded != n:                                  # slice only when we padded
        out_flat = out_flat[:n]
    return out_flat.reshape(orig_shape)


class MixedDropout:
    """JAX/Pallas port of MixedDropout.

    Dense input : jnp.ndarray -> standard dropout on every element.
    Sparse input: tuple (indices [2, nnz] int32, values [nnz], shape) ->
                  dropout applied only to the values (SparseDropout semantics);
                  indices and logical shape pass through unchanged.
    """

    def __init__(self, p):
        self.p = float(p)
        self.training = True

    def __call__(self, x, seed=0):
        if isinstance(x, tuple):  # "is_sparse" path (COO representation)
            indices, values, shape = x
            # TODO(synk): torch .coalesce() (duplicate-index summation) is not
            # implemented; inputs are assumed already coalesced.
            drop_vals = pallas_dropout(values, self.p, seed, self.training)
            return (indices, drop_vals, shape)
        return pallas_dropout(x, self.p, seed, self.training)


if __name__ == "__main__":
    key = jax.random.PRNGKey(0)
    k_dense, k_vals, k_idx = jax.random.split(key, 3)

    p = 0.3
    module = MixedDropout(p)
    scale = 1.0 / (1.0 - p)

    # --- dense path: NCHW input ---
    x_dense = jax.random.normal(k_dense, (2, 4, 16, 16), dtype=jnp.float32)
    y_dense = module(x_dense, seed=123)
    y_dense = jax.block_until_ready(y_dense)
    assert y_dense.shape == x_dense.shape and y_dense.dtype == x_dense.dtype

    # Surviving elements must equal x / (1 - p); dropped elements are 0.
    # (Test-only caveat: exact zeros in x would be classified as dropped.)
    kept = y_dense != 0
    assert bool(
        jnp.allclose(
            jnp.where(kept, y_dense, 0.0),
            jnp.where(kept, x_dense * scale, 0.0),
            atol=1e-5,
        )
    )
    # drop rate should be roughly p
    frac_dropped = float(jnp.mean((y_dense == 0).astype(jnp.float32)))
    assert 0.1 < frac_dropped < 0.5

    # --- sparse path: COO (indices, values, shape) ---
    nnz = 64
    sp_shape = (32, 32)
    rows = jax.random.randint(k_idx, (nnz,), 0, sp_shape[0], dtype=jnp.int32)
    cols = jax.random.randint(jax.random.fold_in(k_idx, 1), (nnz,), 0, sp_shape[1],
                              dtype=jnp.int32)
    indices = jnp.stack([rows, cols], axis=0)           # [2, nnz]
    values = jax.random.normal(k_vals, (nnz,), dtype=jnp.float32)
    sp_idx, sp_vals, sp_out_shape = module((indices, values, sp_shape), seed=456)
    sp_vals = jax.block_until_ready(sp_vals)
    assert sp_vals.shape == values.shape and sp_vals.dtype == values.dtype
    assert sp_out_shape == sp_shape
    kept_s = sp_vals != 0
    assert bool(
        jnp.allclose(
            jnp.where(kept_s, sp_vals, 0.0),
            jnp.where(kept_s, values * scale, 0.0),
            atol=1e-5,
        )
    )

    print("KERNEL_OK")
</pallas_src>

<mosaic_0001>
module attributes {stable_mosaic.version = 11 : i64} {
  func.func @_dropout_kernel(%arg0: i32, %arg1: memref<1xi32, #tpu.memory_space<smem>>, %arg2: memref<8x256xf32, #tpu.memory_space<vmem>>, %arg3: memref<8x256xf32, #tpu.memory_space<vmem>>) attributes {dimension_semantics = [#tpu.dimension_semantics<parallel>], iteration_bounds = array<i64: 1>, scalar_prefetch = 1 : i64, scratch_operands = 0 : i64, tpu.core_type = #tpu.core_type<tc>, window_params = [{transform_indices = @transform_0, window_bounds = array<i64: 8, 256>}, {transform_indices = @transform_1, window_bounds = array<i64: 8, 256>}]} {
    %c8_i32 = arith.constant 8 : i32
    %0 = arith.muli %arg0, %c8_i32 : i32
    %1 = tpu.iota {dimensions = array<i32: 0>} : vector<8x256xi32>
    %2 = vector.broadcast %0 : i32 to vector<8x256xi32>
    %3 = arith.addi %1, %2 : vector<8x256xi32>
    %4 = tpu.iota {dimensions = array<i32: 1>} : vector<8x256xi32>
    %c256_i32 = arith.constant 256 : i32
    %5 = vector.broadcast %c256_i32 : i32 to vector<8x256xi32>
    %6 = arith.muli %3, %5 : vector<8x256xi32>
    %7 = arith.addi %6, %4 : vector<8x256xi32>
    %c0 = arith.constant 0 : index
    %8 = memref.load %arg1[%c0] : memref<1xi32, #tpu.memory_space<smem>>
    %c-1640531527_i32 = arith.constant -1640531527 : i32
    %9 = arith.muli %8, %c-1640531527_i32 : i32
    %10 = vector.broadcast %9 : i32 to vector<8x256xi32>
    %11 = arith.addi %7, %10 : vector<8x256xi32>
    %c16_i32 = arith.constant 16 : i32
    %12 = vector.broadcast %c16_i32 : i32 to vector<8x256xi32>
    %13 = arith.shrui %11, %12 : vector<8x256xi32>
    %14 = arith.xori %11, %13 : vector<8x256xi32>
    %c2146121005_i32 = arith.constant 2146121005 : i32
    %15 = vector.broadcast %c2146121005_i32 : i32 to vector<8x256xi32>
    %16 = arith.muli %14, %15 : vector<8x256xi32>
    %c15_i32 = arith.constant 15 : i32
    %17 = vector.broadcast %c15_i32 : i32 to vector<8x256xi32>
    %18 = arith.shrui %16, %17 : vector<8x256xi32>
    %19 = arith.xori %16, %18 : vector<8x256xi32>
    %c-2073254261_i32 = arith.constant -2073254261 : i32
    %20 = vector.broadcast %c-2073254261_i32 : i32 to vector<8x256xi32>
    %21 = arith.muli %19, %20 : vector<8x256xi32>
    %c16_i32_0 = arith.constant 16 : i32
    %22 = vector.broadcast %c16_i32_0 : i32 to vector<8x256xi32>
    %23 = arith.shrui %21, %22 : vector<8x256xi32>
    %24 = arith.xori %21, %23 : vector<8x256xi32>
    %c1_i32 = arith.constant 1 : i32
    %25 = vector.broadcast %c1_i32 : i32 to vector<8x256xi32>
    %26 = arith.shrui %24, %25 : vector<8x256xi32>
    %c644245094_i32 = arith.constant 644245094 : i32
    %27 = vector.broadcast %c644245094_i32 : i32 to vector<8x256xi32>
    %28 = arith.cmpi sge, %26, %27 : vector<8x256xi32>
    %c0_1 = arith.constant 0 : index
    %c0_2 = arith.constant 0 : index
    %29 = vector.load %arg2[%c0_1, %c0_2] : memref<8x256xf32, #tpu.memory_space<vmem>>, vector<8x256xf32>
    %cst = arith.constant 1.42857146 : f32
    %30 = vector.broadcast %cst : f32 to vector<8x256xf32>
    %31 = arith.mulf %29, %30 : vector<8x256xf32>
    %cst_3 = arith.constant 0.000000e+00 : f32
    %32 = vector.broadcast %cst_3 : f32 to vector<8x256xf32>
    %33 = arith.select %28, %31, %32 : vector<8x256xi1>, vector<8x256xf32>
    %c0_4 = arith.constant 0 : index
    %c0_5 = arith.constant 0 : index
    %34 = vector.load %arg3[%c0_4, %c0_5] : memref<8x256xf32, #tpu.memory_space<vmem>>, vector<8x256xf32>
    tpu.vector_store %arg3[%c0_4, %c0_5], %33 {strides = array<i32>} : memref<8x256xf32, #tpu.memory_space<vmem>>, vector<8x256xf32>,
    return
  }
  func.func @transform_0(%arg0: i32, %arg1: memref<1xi32, #tpu.memory_space<smem>>) -> (i32, i32) {
    %c0_i32 = arith.constant 0 : i32
    %c0_i32_0 = arith.constant 0 : i32
    return %arg0, %c0_i32 : i32, i32
  }
  func.func @transform_1(%arg0: i32, %arg1: memref<1xi32, #tpu.memory_space<smem>>) -> (i32, i32) {
    %c0_i32 = arith.constant 0 : i32
    %c0_i32_0 = arith.constant 0 : i32
    return %arg0, %c0_i32 : i32, i32
  }
}

</mosaic_0001>

<bundles_post_ra>
// kernel: tpu_custom_call.1
= control target key start
LH: loop header
LB: loop body
LE: loop exit
PB: predicated region body
PF: predicated region fallthrough
CT: control target
= control target key end

     0   :  { %8 = vsyncpa [#allocation5], 0  ;;  %s176_s0 = inlined_call_operand.<no memory space> [shape: s32[1], index: 0, kind: input, shape index: {}]   ;;  %s177_s1 = inlined_call_operand.hbm [shape: f32[8,256], index: 1, kind: input, shape index: {}]   ;;  %s178_s2 = inlined_call_operand.hbm [shape: f32[8,256], index: 2, kind: output, shape index: {}]  }
   0x1   :  { %9 = vsyncpa [#allocation6], 0  ;;  %s132_s9 = smov [#allocation4]   ;;  %s84_s13 = scalar_lea.hbm %s177_s1, 256 }
   0x2   :  { %s16_s10 = sshll.u32 %s132_s9, 4  ;;  %p85_p0 = scmp.ne.s32.totalorder %s177_s1, %s84_s13  ;;  %s17_s10 = int_to_ptr.vmem [resolvable:$true] %s16_s10 }
   0x3   :  { %p88_p1 = scmp.lt.u32.totalorder %s84_s13, %s177_s1 }
   0x5   :  { %p90_p2 = pnand %p88_p1, %p85_p0 }
   0x7   :  { %93 = shalt.err (!%p90_p2)
}
   0x8   :  { %s94_s18 = scalar_lea.vmem %s17_s10, 256  ;;  %p99_p4 = scmp.lt.s32.totalorder %s17_s10, %s17_s10 }
   0x9   :  { %p95_p3 = scmp.ne.s32.totalorder %s17_s10, %s94_s18  ;;  %p100_p5 = scmp.lt.s32.totalorder %s94_s18, %s94_s18 }
   0xb   :  { %p101_p6 = por %p100_p5, %p99_p4 }
   0xd   :  { %p102_p7 = pnand %p101_p6, %p95_p3 }
   0xf   :  { %105 = shalt.err (!%p102_p7)
}
  0x10   :  { %19 = dma.hbm_to_vmem [thread:$0]  %s177_s1, 256, %s17_s10, [#allocation5]  }
  0x11   :  { %128 = dma.done.wait [#allocation5], 256  }
  0x12   :  { %129 = vsyncadd [#allocation5], 4294967040  ;;  %v24_v0 = vlaneseq  ;;  %s35_s23 = smul.u32 2654435769, %s176_s0  ;;  %v59_v23 = vld [vmem:[#allocation4] sm:$0xff]  ;;  %v60_v25 = vld [vmem:[#allocation4 + $0x8] sm:$0xff] }
  0x13   :  { %v61_v28 = vmul.f32 1.4285715, %v59_v23  ;;  %v62_v29 = vmul.f32 1.4285715, %v60_v25  ;;  %s133_s0 = smov [#allocation7]  }
  0x14   :  { %v25_v1 = vshrl.u32 %v24_v0, 7  ;;  %v29_v2 = vand.u32 127, %v24_v0  ;;  %v36_v5 = vstv %s35_s23  ;;  %s73_s1 = sshll.u32 %s133_s0, 4  ;;  %s74_s1 = int_to_ptr.vmem [resolvable:$true] %s73_s1 }
  0x15   :  { %s106_s24 = scalar_lea.vmem %s74_s1, 256  ;;  %p111_p9 = scmp.lt.s32.totalorder %s74_s1, %s74_s1 }
  0x16   :  { %v31_v3 = vmul.u32 256, %v25_v1  ;;  %v30_v4 = vadd.s32 128, %v29_v2  ;;  %p107_p8 = scmp.ne.s32.totalorder %s74_s1, %s106_s24  ;;  %p112_p10 = scmp.lt.s32.totalorder %s106_s24, %s106_s24 }
  0x18   :  { %v32_v6 = vadd.s32 %v31_v3, %v29_v2  ;;  %v33_v7 = vadd.s32 %v31_v3, %v30_v4  ;;  %p113_p11 = por %p112_p10, %p111_p9 }
  0x1a   :  { %v37_v8 = vadd.s32 %v36_v5, %v32_v6  ;;  %v38_v9 = vadd.s32 %v36_v5, %v33_v7  ;;  %p114_p12 = pnand %p113_p11, %p107_p8 }
  0x1c   :  { %v39_v10 = vshrl.u32 %v37_v8, 16  ;;  %v40_v11 = vshrl.u32 %v38_v9, 16 }
  0x1e   :  { %v41_v12 = vxor.u32 %v39_v10, %v37_v8  ;;  %v42_v13 = vxor.u32 %v40_v11, %v38_v9 }
  0x20   :  { %v43_v14 = vmul.u32 2146121005, %v41_v12  ;;  %v44_v15 = vmul.u32 2146121005, %v42_v13 }
  0x22   :  { %v45_v16 = vshrl.u32 %v43_v14, 15  ;;  %v46_v17 = vshrl.u32 %v44_v15, 15 }
  0x24   :  { %v47_v18 = vxor.u32 %v45_v16, %v43_v14  ;;  %v48_v19 = vxor.u32 %v46_v17, %v44_v15 }
  0x26   :  { %v49_v20 = vmul.u32 2221713035, %v47_v18  ;;  %v50_v21 = vmul.u32 2221713035, %v48_v19 }
  0x28   :  { %v51_v22 = vshrl.u32 %v49_v20, 16  ;;  %v52_v24 = vshrl.u32 %v50_v21, 16 }
  0x2a   :  { %v53_v26 = vxor.u32 %v51_v22, %v49_v20  ;;  %v54_v27 = vxor.u32 %v52_v24, %v50_v21 }
  0x2c   :  { %v55_v30 = vshrl.u32 %v53_v26, 1  ;;  %v56_v31 = vshrl.u32 %v54_v27, 1 }
  0x2e   :  { %vm57_vm0 = vcmp.ge.s32.totalorder %v55_v30, 644245094  ;;  %vm58_vm1 = vcmp.ge.s32.totalorder %v56_v31, 644245094 }
  0x2f   :  { %v63_v32 = vsel %vm57_vm0, %v61_v28, 0.0  ;;  %v64_v33 = vsel %vm58_vm1, %v62_v29, 0.0 }
  0x30   :  { %65 = vst [vmem:[#allocation7] sm:$0xff] %v63_v32  ;;  %66 = vst [vmem:[#allocation7 + $0x8] sm:$0xff] %v64_v33 }
  0x31   :  { %117 = shalt.err (!%p114_p12)
}
  0x32   :  { %s118_s27 = scalar_lea.hbm %s178_s2, 256 }
  0x33   :  { %p119_p13 = scmp.ne.s32.totalorder %s178_s2, %s118_s27  ;;  %p122_p0 = scmp.lt.u32.totalorder %s118_s27, %s178_s2 }
  0x35   :  { %p124_p1 = pnand %p122_p0, %p119_p13 }
  0x37   :  { %127 = shalt.err (!%p124_p1)
}
  0x38   :  { %76 = dma.vmem_to_hbm [thread:$0]  %s74_s1, 256, %s178_s2, [#allocation6]  }
  0x39   :  { %130 = dma.done.wait [#allocation6], 256  }
  0x3a   :  { %131 = vsyncadd [#allocation6], 4294967040 }
  0x3b   :  { %80 = vsyncpa [#allocation5], 1 }
  0x3c   :  { %81 = vsyncpa [#allocation6], 1 }

</bundles_post_ra>
